<compile_context>
chip_gen: v7x
topology: tpu7x:2x2x1
jax: 0.10.0
libtpu: 0.0.40
codegen_flags: <defaults>
</compile_context>

<pallas_src>
import functools

import jax
import jax.numpy as jnp
from jax.experimental import pallas as pl
from jax.experimental.pallas import tpu as pltpu


NEG_INF = -1e10
LN_EPS = 1e-5
VMEM_LIMIT = 48 * 1024 * 1024   # < 64 MiB physical on v7x, > 32 MiB default


def _cparams(semantics):
    return pltpu.CompilerParams(dimension_semantics=semantics,
                                vmem_limit_bytes=VMEM_LIMIT)


# ----------------------------------------------------------------------------
# Kernels
# ----------------------------------------------------------------------------
def _linear_kernel(x_ref, w_ref, b_ref, o_ref, *, cdt):
    """y = x @ W + b  (full-width projection; fused QKV / KV / Q)."""
    x = x_ref[0].astype(cdt)                                   # [Tl, H]
    acc = jnp.dot(x, w_ref[...], preferred_element_type=jnp.float32)
    o_ref[0] = (acc + b_ref[0]).astype(o_ref.dtype)


def _attn_kernel(q_ref, k_ref, v_ref, bias_ref, *rest, inv_scale, return_attn):
    """Flash-style attention for one (batch, head, q-tile); kv tiles on axis 3."""
    if return_attn:
        o_ref, attn_ref, m_ref, l_ref, acc_ref = rest
    else:
        o_ref, m_ref, l_ref, acc_ref = rest
        attn_ref = None

    kv_i = pl.program_id(3)
    last_kv = pl.num_programs(3) - 1

    @pl.when(kv_i == 0)
    def _():
        m_ref[...] = jnp.full_like(m_ref, -jnp.inf)
        l_ref[...] = jnp.zeros_like(l_ref)
        acc_ref[...] = jnp.zeros_like(acc_ref)

    q = q_ref[0, 0] * inv_scale                                # [tq, hd]
    k = k_ref[0, 0]                                            # [tk, hd]
    v = v_ref[0, 0]                                            # [tk, hd]

    energy = jax.lax.dot_general(q, k, (((1,), (1,)), ((), ())),
                                 preferred_element_type=jnp.float32)
    energy = energy + bias_ref[0]                              # 0 / -1e10 mask

    m_prev = m_ref[...]
    m_new = jnp.maximum(m_prev, jnp.max(energy, axis=-1, keepdims=True))
    alpha = jnp.exp(m_prev - m_new)
    p = jnp.exp(energy - m_new)                                # [tq, tk] f32
    l_ref[...] = alpha * l_ref[...] + jnp.sum(p, axis=-1, keepdims=True)
    acc_ref[...] = alpha * acc_ref[...] + jax.lax.dot_general(
        p.astype(v.dtype), v, (((1,), (0,)), ((), ())),
        preferred_element_type=jnp.float32)
    m_ref[...] = m_new

    @pl.when(kv_i == last_kv)
    def _():
        inv_l = pl.reciprocal(l_ref[...], approx=True)
        o_ref[0, 0] = (acc_ref[...] * inv_l).astype(o_ref.dtype)

    if return_attn:
        # Normalized weights are emitted in one pass only when there is a single
        # kv block (enforced by the wrapper for the encoder-attention call).
        # TODO(synk): a two-pass rescale would allow kv tiling here as well.
        @pl.when(kv_i == last_kv)
        def _():
            inv_l = pl.reciprocal(l_ref[...], approx=True)
            attn_ref[0, 0] = (p * inv_l).astype(attn_ref.dtype)


def _out_proj_add_ln_kernel(ctx_ref, res_ref, w_ref, b_ref, g_ref, beta_ref,
                            out_ref, *, cdt, eps):
    """out = LayerNorm(residual + ctx @ Wo + bo)   (single K=H matmul)."""
    ctx = ctx_ref[0].astype(cdt)
    o = jnp.dot(ctx, w_ref[...], preferred_element_type=jnp.float32) + b_ref[0]
    z = o + res_ref[0].astype(jnp.float32)
    mean = jnp.mean(z, axis=-1, keepdims=True)
    var = jnp.mean((z - mean) ** 2, axis=-1, keepdims=True)
    out_ref[0] = ((z - mean) * jax.lax.rsqrt(var + eps) * g_ref[0]
                  + beta_ref[0]).astype(out_ref.dtype)


def _ffn_add_ln_kernel(x_ref, w1_ref, b1_ref, w2_ref, b2_ref, g_ref, beta_ref,
                       out_ref, acc_ref, *, cdt, eps):
    """Positionwise FFN with the pf dim tiled as a reduction grid axis;
    residual add + LayerNorm fused into the last reduction step."""
    p_i = pl.program_id(2)

    @pl.when(p_i == 0)
    def _():
        acc_ref[...] = jnp.zeros_like(acc_ref)

    x = x_ref[0].astype(cdt)                                   # [Tl, H]
    h = jnp.dot(x, w1_ref[...], preferred_element_type=jnp.float32) + b1_ref[0]
    h = jnp.maximum(h, 0.0).astype(cdt)                        # [Tl, tp]
    acc_ref[...] += jnp.dot(h, w2_ref[...], preferred_element_type=jnp.float32)

    @pl.when(p_i == pl.num_programs(2) - 1)
    def _():
        z = acc_ref[...] + b2_ref[0] + x_ref[0].astype(jnp.float32)
        mean = jnp.mean(z, axis=-1, keepdims=True)
        var = jnp.mean((z - mean) ** 2, axis=-1, keepdims=True)
        out_ref[0] = ((z - mean) * jax.lax.rsqrt(var + eps) * g_ref[0]
                      + beta_ref[0]).astype(out_ref.dtype)


# ----------------------------------------------------------------------------
# Tiling helpers
# ----------------------------------------------------------------------------
def _seq_tile_and_pad(n):
    """Pick a sequence tile and the padded length (multiple of the tile)."""
    if n <= 128:
        return n, n
    for t in (512, 256, 128):
        if n % t == 0:
            return t, n
    t = 128
    return t, ((n + t - 1) // t) * t


def _kv_tile(n):
    for t in (512, 256, 128):
        if n >= t and n % t == 0:
            return t
    return n


# ----------------------------------------------------------------------------
# Pallas wrappers
# ----------------------------------------------------------------------------
def linear(x, w, b, *, cdt, seq_tile, out_dtype):
    B, L, H = x.shape
    dout = w.shape[1]
    nl = L // seq_tile
    return pl.pallas_call(
        functools.partial(_linear_kernel, cdt=cdt),
        out_shape=jax.ShapeDtypeStruct((B, L, dout), out_dtype),
        grid=(B, nl),
        in_specs=[pl.BlockSpec((1, seq_tile, H), lambda b, t: (b, t, 0)),
                  pl.BlockSpec((H, dout), lambda b, t: (0, 0)),
                  pl.BlockSpec((1, dout), lambda b, t: (0, 0))],
        out_specs=pl.BlockSpec((1, seq_tile, dout), lambda b, t: (b, t, 0)),
        compiler_params=_cparams(("parallel", "parallel")),
    )(x, w, b)


def attention(qh, kh, vh, bias, *, return_attn, seq_tile, cdt):
    B, nh, Lq, hd = qh.shape
    Lk = kh.shape[2]
    inv_scale = 1.0 / (float(hd) ** 0.5)
    tq = seq_tile
    nq = Lq // tq
    tk = Lk if return_attn else _kv_tile(Lk)   # single kv block when emitting weights
    nk = Lk // tk

    kernel = functools.partial(_attn_kernel, inv_scale=inv_scale,
                               return_attn=return_attn)

    in_specs = [
        pl.BlockSpec((1, 1, tq, hd), lambda b, h, t, k: (b, h, t, 0)),
        pl.BlockSpec((1, 1, tk, hd), lambda b, h, t, k: (b, h, k, 0)),
        pl.BlockSpec((1, 1, tk, hd), lambda b, h, t, k: (b, h, k, 0)),
        pl.BlockSpec((1, tq, tk), lambda b, h, t, k: (b, t, k)),
    ]
    ctx_spec = pl.BlockSpec((1, 1, tq, hd), lambda b, h, t, k: (b, h, t, 0))
    scratch = [pltpu.VMEM((tq, 1), jnp.float32),     # running max
               pltpu.VMEM((tq, 1), jnp.float32),     # running sum
               pltpu.VMEM((tq, hd), jnp.float32)]    # unnormalized ctx

    if return_attn:
        out_shape = (jax.ShapeDtypeStruct((B, nh, Lq, hd), cdt),
                     jax.ShapeDtypeStruct((B, nh, Lq, Lk), jnp.float32))
        out_specs = (ctx_spec,
                     pl.BlockSpec((1, 1, tq, tk), lambda b, h, t, k: (b, h, t, k)))
    else:
        out_shape = jax.ShapeDtypeStruct((B, nh, Lq, hd), cdt)
        out_specs = ctx_spec

    return pl.pallas_call(
        kernel, out_shape=out_shape, grid=(B, nh, nq, nk),
        in_specs=in_specs, out_specs=out_specs, scratch_shapes=scratch,
        compiler_params=_cparams(("parallel", "parallel", "parallel", "arbitrary")),
    )(qh, kh, vh, bias)


def out_proj_add_ln(ctx, residual, wo, bo, ln_p, *, cdt, seq_tile, eps=LN_EPS):
    B, L, H = residual.shape
    nl = L // seq_tile
    return pl.pallas_call(
        functools.partial(_out_proj_add_ln_kernel, cdt=cdt, eps=eps),
        out_shape=jax.ShapeDtypeStruct((B, L, H), jnp.float32),
        grid=(B, nl),
        in_specs=[pl.BlockSpec((1, seq_tile, H), lambda b, t: (b, t, 0)),
                  pl.BlockSpec((1, seq_tile, H), lambda b, t: (b, t, 0)),
                  pl.BlockSpec((H, H), lambda b, t: (0, 0)),
                  pl.BlockSpec((1, H), lambda b, t: (0, 0)),
                  pl.BlockSpec((1, H), lambda b, t: (0, 0)),
                  pl.BlockSpec((1, H), lambda b, t: (0, 0))],
        out_specs=pl.BlockSpec((1, seq_tile, H), lambda b, t: (b, t, 0)),
        compiler_params=_cparams(("parallel", "parallel")),
    )(ctx, residual, wo, bo, ln_p["g"], ln_p["b"])


def ffn_add_ln(x, ffn_p, ln_p, *, cdt, seq_tile, eps=LN_EPS):
    B, L, H = x.shape
    P = ffn_p["w1"].shape[1]
    tp = _kv_tile(P)
    npp = P // tp
    nl = L // seq_tile
    w1 = ffn_p["w1"].astype(cdt)
    w2 = ffn_p["w2"].astype(cdt)
    return pl.pallas_call(
        functools.partial(_ffn_add_ln_kernel, cdt=cdt, eps=eps),
        out_shape=jax.ShapeDtypeStruct((B, L, H), jnp.float32),
        grid=(B, nl, npp),
        in_specs=[pl.BlockSpec((1, seq_tile, H), lambda b, t, p: (b, t, 0)),
                  pl.BlockSpec((H, tp), lambda b, t, p: (0, p)),
                  pl.BlockSpec((1, tp), lambda b, t, p: (0, p)),
                  pl.BlockSpec((tp, H), lambda b, t, p: (p, 0)),
                  pl.BlockSpec((1, H), lambda b, t, p: (0, 0)),
                  pl.BlockSpec((1, H), lambda b, t, p: (0, 0)),
                  pl.BlockSpec((1, H), lambda b, t, p: (0, 0))],
        out_specs=pl.BlockSpec((1, seq_tile, H), lambda b, t, p: (b, t, 0)),
        scratch_shapes=[pltpu.VMEM((seq_tile, H), jnp.float32)],
        compiler_params=_cparams(("parallel", "parallel", "arbitrary")),
    )(x, w1, ffn_p["b1"], w2, ffn_p["b2"], ln_p["g"], ln_p["b"])


def mha_add_ln(q_src, kv_src, bias, attn_p, ln_p, n_heads, *, self_attention,
               return_attn, cdt, seq_tile, kv_seq_tile):
    """out = LayerNorm(q_src + MHA(q_src, kv_src, kv_src, mask)); optional attn."""
    B, Lq, H = q_src.shape
    Lk = kv_src.shape[1]
    hd = H // n_heads

    wq = attn_p["wq"].astype(cdt)
    wk = attn_p["wk"].astype(cdt)
    wv = attn_p["wv"].astype(cdt)
    wo = attn_p["wo"].astype(cdt)

    if self_attention:
        # Fused [H, 3H] projection: one full-width matmul for Q, K and V.
        wqkv = jnp.concatenate([wq, wk, wv], axis=1)
        bqkv = jnp.concatenate([attn_p["bq"], attn_p["bk"], attn_p["bv"]], axis=1)
        qkv = linear(q_src, wqkv, bqkv, cdt=cdt, seq_tile=seq_tile, out_dtype=cdt)
        q, k, v = qkv[..., :H], qkv[..., H:2 * H], qkv[..., 2 * H:]
    else:
        q = linear(q_src, wq, attn_p["bq"], cdt=cdt, seq_tile=seq_tile,
                   out_dtype=cdt)
        wkv = jnp.concatenate([wk, wv], axis=1)
        bkv = jnp.concatenate([attn_p["bk"], attn_p["bv"]], axis=1)
        kv = linear(kv_src, wkv, bkv, cdt=cdt, seq_tile=kv_seq_tile,
                    out_dtype=cdt)
        k, v = kv[..., :H], kv[..., H:]

    # Head split / merge = wrapper-side layout plumbing (plain XLA).
    def to_heads(x, L):
        return x.reshape(B, L, n_heads, hd).transpose(0, 2, 1, 3)

    qh, kh, vh = to_heads(q, Lq), to_heads(k, Lk), to_heads(v, Lk)

    if return_attn:
        ctx, attn = attention(qh, kh, vh, bias, return_attn=True,
                              seq_tile=seq_tile, cdt=cdt)
    else:
        ctx = attention(qh, kh, vh, bias, return_attn=False,
                        seq_tile=seq_tile, cdt=cdt)
        attn = None

    ctx_flat = ctx.transpose(0, 2, 1, 3).reshape(B, Lq, H)
    out = out_proj_add_ln(ctx_flat, q_src, wo, attn_p["bo"], ln_p,
                          cdt=cdt, seq_tile=seq_tile)
    return out, attn


def _mask_to_bias(mask, B, Lq, Lk, Lq_p, Lk_p):
    """[B,1,Lq|1,Lk] 0/1 mask -> [B,Lq_p,Lk_p] additive bias (0 / -1e10)."""
    m = jnp.broadcast_to(mask, (B, 1, Lq, Lk))[:, 0].astype(jnp.float32)
    if (Lq_p, Lk_p) != (Lq, Lk):
        m = jnp.pad(m, ((0, 0), (0, Lq_p - Lq), (0, Lk_p - Lk)))  # pad -> masked
    return jnp.where(m == 0.0, NEG_INF, 0.0).astype(jnp.float32)


def decoder_layer(trg, enc_src, trg_mask, src_mask, params, n_heads,
                  compute_dtype=jnp.float32):
    """Matches DecoderLayer.forward (dropout = identity / eval mode)."""
    B, Lt, H = trg.shape
    Ls = enc_src.shape[1]
    tq, Lt_p = _seq_tile_and_pad(Lt)
    ts, Ls_p = _seq_tile_and_pad(Ls)

    trg_p = trg if Lt_p == Lt else jnp.pad(trg, ((0, 0), (0, Lt_p - Lt), (0, 0)))
    enc_p = (enc_src if Ls_p == Ls
             else jnp.pad(enc_src, ((0, 0), (0, Ls_p - Ls), (0, 0))))

    trg_bias = _mask_to_bias(trg_mask, B, Lt, Lt, Lt_p, Lt_p)
    src_bias = _mask_to_bias(src_mask, B, Lt, Ls, Lt_p, Ls_p)
    cdt = compute_dtype

    # self-attention + add & norm (attention weights discarded -> not emitted)
    x, _ = mha_add_ln(trg_p, trg_p, trg_bias, params["self_attn"],
                      params["ln_self"], n_heads, self_attention=True,
                      return_attn=False, cdt=cdt, seq_tile=tq, kv_seq_tile=tq)
    # encoder-decoder attention + add & norm (returns attention weights)
    x, attn = mha_add_ln(x, enc_p, src_bias, params["enc_attn"],
                         params["ln_enc"], n_heads, self_attention=False,
                         return_attn=True, cdt=cdt, seq_tile=tq, kv_seq_tile=ts)
    # positionwise feed-forward + add & norm
    x = ffn_add_ln(x, params["ffn"], params["ln_ff"], cdt=cdt, seq_tile=tq)

    out = x[:, :Lt] if Lt_p != Lt else x
    if Lt_p != Lt or Ls_p != Ls:
        attn = attn[:, :, :Lt, :Ls]
    return out, attn


# ----------------------------------------------------------------------------
# Pure-JAX reference (correctness sanity check)
# ----------------------------------------------------------------------------
def _ref_mha(q, k, v, mask, p, n_heads):
    B, Lq, H = q.shape
    Lk = k.shape[1]
    hd = H // n_heads
    Q = (q @ p["wq"] + p["bq"][0]).reshape(B, Lq, n_heads, hd).transpose(0, 2, 1, 3)
    K = (k @ p["wk"] + p["bk"][0]).reshape(B, Lk, n_heads, hd).transpose(0, 2, 1, 3)
    V = (v @ p["wv"] + p["bv"][0]).reshape(B, Lk, n_heads, hd).transpose(0, 2, 1, 3)
    energy = jnp.einsum("bhqd,bhkd->bhqk", Q, K) / jnp.sqrt(float(hd))
    energy = jnp.where(mask == 0.0, NEG_INF, energy)
    attn = jax.nn.softmax(energy, axis=-1)
    x = jnp.einsum("bhqk,bhkd->bhqd", attn, V).transpose(0, 2, 1, 3).reshape(B, Lq, H)
    return x @ p["wo"] + p["bo"][0], attn


def _ref_ln(x, res, p, eps=LN_EPS):
    z = x + res
    mu = z.mean(-1, keepdims=True)
    var = ((z - mu) ** 2).mean(-1, keepdims=True)
    return (z - mu) / jnp.sqrt(var + eps) * p["g"][0] + p["b"][0]


def _ref_decoder(trg, enc_src, trg_mask, src_mask, params, n_heads):
    B, Lt, H = trg.shape
    Ls = enc_src.shape[1]
    tm = jnp.broadcast_to(trg_mask, (B, n_heads, Lt, Lt)).astype(jnp.float32)
    sm = jnp.broadcast_to(src_mask, (B, n_heads, Lt, Ls)).astype(jnp.float32)
    _t, _ = _ref_mha(trg, trg, trg, tm, params["self_attn"], n_heads)
    trg = _ref_ln(_t, trg, params["ln_self"])
    _t, attn = _ref_mha(trg, enc_src, enc_src, sm, params["enc_attn"], n_heads)
    trg = _ref_ln(_t, trg, params["ln_enc"])
    p = params["ffn"]
    _t = jnp.maximum(trg @ p["w1"] + p["b1"][0], 0.0) @ p["w2"] + p["b2"][0]
    trg = _ref_ln(_t, trg, params["ln_ff"])
    return trg, attn


# ----------------------------------------------------------------------------
# Parameter init
# ----------------------------------------------------------------------------
def init_params(key, hid_dim, n_heads, pf_dim):
    ks = jax.random.split(key, 20)
    s = 0.05

    def lin(ki, kb, din, dout):
        return (jax.random.normal(ki, (din, dout), jnp.float32) * s,
                jax.random.normal(kb, (1, dout), jnp.float32) * s)

    def attn(base):
        wq, bq = lin(ks[base + 0], ks[base + 1], hid_dim, hid_dim)
        wk, bk = lin(ks[base + 2], ks[base + 3], hid_dim, hid_dim)
        wv, bv = lin(ks[base + 4], ks[base + 5], hid_dim, hid_dim)
        wo, bo = lin(ks[base + 6], ks[base + 7], hid_dim, hid_dim)
        return dict(wq=wq, bq=bq, wk=wk, bk=bk, wv=wv, bv=bv, wo=wo, bo=bo)

    w1, b1 = lin(ks[16], ks[17], hid_dim, pf_dim)
    w2, b2 = lin(ks[18], ks[19], pf_dim, hid_dim)
    ln = lambda: dict(g=jnp.ones((1, hid_dim), jnp.float32),
                      b=jnp.zeros((1, hid_dim), jnp.float32))
    return dict(self_attn=attn(0), enc_attn=attn(8),
                ffn=dict(w1=w1, b1=b1, w2=w2, b2=b2),
                ln_self=ln(), ln_enc=ln(), ln_ff=ln())


# ----------------------------------------------------------------------------
if __name__ == "__main__":
    B, Lt, Ls = 2, 8, 8
    hid_dim, n_heads, pf_dim = 32, 4, 64

    key = jax.random.PRNGKey(0)
    k1, k2, k3 = jax.random.split(key, 3)
    trg = jax.random.normal(k1, (B, Lt, hid_dim), jnp.float32)
    enc_src = jax.random.normal(k2, (B, Ls, hid_dim), jnp.float32)

    # causal target mask [B, 1, Lt, Lt]; source padding mask [B, 1, 1, Ls]
    trg_mask = jnp.tril(jnp.ones((Lt, Lt), jnp.float32))[None, None]
    trg_mask = jnp.broadcast_to(trg_mask, (B, 1, Lt, Lt))
    src_mask = jnp.ones((B, 1, 1, Ls), jnp.float32).at[1, 0, 0, -2:].set(0.0)

    params = init_params(k3, hid_dim, n_heads, pf_dim)

    # f32 path (matches module semantics; approx reciprocal -> ~1e-4 deviation)
    out, attention_w = decoder_layer(trg, enc_src, trg_mask, src_mask,
                                     params, n_heads)
    out = jax.block_until_ready(out)
    attention_w = jax.block_until_ready(attention_w)

    ref_out, ref_attn = _ref_decoder(trg, enc_src, trg_mask, src_mask,
                                     params, n_heads)
    assert out.shape == (B, Lt, hid_dim)
    assert attention_w.shape == (B, n_heads, Lt, Ls)
    assert jnp.allclose(out, ref_out, rtol=1e-2, atol=1e-2)
    assert jnp.allclose(attention_w, ref_attn, rtol=1e-2, atol=1e-2)

    # bf16 MXU-operand path (f32 accumulation / softmax / LayerNorm).
    out_bf, attn_bf = decoder_layer(trg, enc_src, trg_mask, src_mask, params,
                                    n_heads, compute_dtype=jnp.bfloat16)
    out_bf = jax.block_until_ready(out_bf)
    attn_bf = jax.block_until_ready(attn_bf)
    assert jnp.allclose(out_bf, ref_out, rtol=7e-2, atol=7e-2)
    assert jnp.allclose(attn_bf, ref_attn, rtol=7e-2, atol=7e-2)

    print("KERNEL_OK")
</pallas_src>

<mosaic_0001>
module attributes {stable_mosaic.version = 11 : i64} {
  func.func @_linear_kernel(%arg0: i32, %arg1: i32, %arg2: memref<1x8x32xf32, #tpu.memory_space<vmem>>, %arg3: memref<32x96xf32, #tpu.memory_space<vmem>>, %arg4: memref<1x96xf32, #tpu.memory_space<vmem>>, %arg5: memref<1x8x96xf32, #tpu.memory_space<vmem>>) attributes {dimension_semantics = [#tpu.dimension_semantics<parallel>, #tpu.dimension_semantics<parallel>], iteration_bounds = array<i64: 2, 1>, scalar_prefetch = 0 : i64, scratch_operands = 0 : i64, tpu.core_type = #tpu.core_type<tc>, window_params = [{transform_indices = @transform_0, window_bounds = array<i64: 1, 8, 32>}, {pipeline_mode = #tpu.pipeline_mode<synchronous>, transform_indices = @transform_1, window_bounds = array<i64: 32, 96>}, {pipeline_mode = #tpu.pipeline_mode<synchronous>, transform_indices = @transform_2, window_bounds = array<i64: 1, 96>}, {transform_indices = @transform_3, window_bounds = array<i64: 1, 8, 96>}]} {
    %c0 = arith.constant 0 : index
    %c0_0 = arith.constant 0 : index
    %c0_1 = arith.constant 0 : index
    %0 = vector.load %arg2[%c0, %c0_0, %c0_1] : memref<1x8x32xf32, #tpu.memory_space<vmem>>, vector<1x8x32xf32>
    %1 = vector.shape_cast %0 : vector<1x8x32xf32> to vector<8x32xf32>
    %c0_2 = arith.constant 0 : index
    %c0_3 = arith.constant 0 : index
    %2 = vector.load %arg3[%c0_2, %c0_3] : memref<32x96xf32, #tpu.memory_space<vmem>>, vector<32x96xf32>
    %cst = arith.constant dense<0.000000e+00> : vector<8x96xf32>
    %3 = tpu.matmul %1, %2, %cst {dimension_numbers = #tpu.dot_dimension_numbers<[1], [0], [0], [1], [0, 0, 1, 1], [], []>} : vector<8x32xf32>, vector<32x96xf32>, vector<8x96xf32> -> vector<8x96xf32>
    %c0_4 = arith.constant 0 : index
    %c0_5 = arith.constant 0 : index
    %4 = vector.load %arg4[%c0_4, %c0_5] : memref<1x96xf32, #tpu.memory_space<vmem>>, vector<1x96xf32>
    %5 = vector.shape_cast %4 : vector<1x96xf32> to vector<96xf32>
    %6 = vector.shape_cast %5 : vector<96xf32> to vector<1x96xf32>
    %7 = vector.broadcast %6 : vector<1x96xf32> to vector<8x96xf32>
    %8 = arith.addf %3, %7 : vector<8x96xf32>
    %c0_6 = arith.constant 0 : index
    %c0_7 = arith.constant 0 : index
    %c0_8 = arith.constant 0 : index
    %9 = vector.load %arg5[%c0_6, %c0_7, %c0_8] : memref<1x8x96xf32, #tpu.memory_space<vmem>>, vector<1x8x96xf32>
    %10 = vector.shape_cast %9 : vector<1x8x96xf32> to vector<8x96xf32>
    %11 = vector.shape_cast %8 : vector<8x96xf32> to vector<1x8x96xf32>
    tpu.vector_store %arg5[%c0_6, %c0_7, %c0_8], %11 {strides = array<i32>} : memref<1x8x96xf32, #tpu.memory_space<vmem>>, vector<1x8x96xf32>,
    return
  }
  func.func @transform_0(%arg0: i32, %arg1: i32) -> (i32, i32, i32) {
    %c0_i32 = arith.constant 0 : i32
    %c0_i32_0 = arith.constant 0 : i32
    return %arg0, %arg1, %c0_i32 : i32, i32, i32
  }
  func.func @transform_1(%arg0: i32, %arg1: i32) -> (i32, i32) {
    %c0_i32 = arith.constant 0 : i32
    %c0_i32_0 = arith.constant 0 : i32
    %c0_i32_1 = arith.constant 0 : i32
    return %c0_i32, %c0_i32_0 : i32, i32
  }
  func.func @transform_2(%arg0: i32, %arg1: i32) -> (i32, i32) {
    %c0_i32 = arith.constant 0 : i32
    %c0_i32_0 = arith.constant 0 : i32
    %c0_i32_1 = arith.constant 0 : i32
    return %c0_i32, %c0_i32_0 : i32, i32
  }
  func.func @transform_3(%arg0: i32, %arg1: i32) -> (i32, i32, i32) {
    %c0_i32 = arith.constant 0 : i32
    %c0_i32_0 = arith.constant 0 : i32
    return %arg0, %arg1, %c0_i32 : i32, i32, i32
  }
}

</mosaic_0001>

<bundles_post_ra>
// kernel: tpu_custom_call.1
= control target key start
LH: loop header
LB: loop body
LE: loop exit
PB: predicated region body
PF: predicated region fallthrough
CT: control target
= control target key end

     0   :  { %8 = vsyncpa [#allocation3], 0  ;;  %s919_s0 = inlined_call_operand.hbm [shape: f32[2,8,32], index: 0, kind: input, shape index: {}]   ;;  %s920_s1 = inlined_call_operand.hbm [shape: f32[32,96], index: 1, kind: input, shape index: {}]   ;;  %s921_s2 = inlined_call_operand.vmem [shape: f32[1,96], index: 2, kind: input, shape index: {}]   ;;  %s922_s3 = inlined_call_operand.hbm [shape: f32[2,8,96], index: 3, kind: output, shape index: {}]  }
   0x1   :  { %10 = vsyncpa [#allocation3 + $0x1], 0 }
   0x2   :  { %11 = vsyncpa [#allocation6], 0 }
   0x3   :  { %12 = vsyncpa [#allocation4], 0 }
   0x4   :  { %14 = vsyncpa [#allocation4 + $0x1], 0  ;;  %s702_s12 = smov 0   ;;  %s704_s13 = smov 0  }
   0x5   :  { %s706_s14 = smov 0   ;;  %s708_s15 = smov 0  }
   0x6   :  { %s710_s16 = smov 0   ;;  %s712_s17 = smov 0  }
   0x7 LB: > { %s411_s18 = sadd.s32 4294967295, %s672_s17   ;;  %s412_s19 = sadd.s32 4294967294, %s672_s17   ;;  %s672_s17 = sphi %s712_s17, %s20_s17   ;;  %s668_s16 = sphi %s710_s16, %s946_s16   ;;  %s664_s15 = sphi %s708_s15, %s945_s15   ;;  %s660_s14 = sphi %s706_s14, %s944_s14   ;;  %s656_s13 = sphi %s704_s13, %s943_s13   ;;  %s652_s12 = sphi %s702_s12, %s942_s12  }
   0x8   : > { %p54_p0 = scmp.ne.s32.totalorder %s656_s13, %s652_s12  ;;  %p736_p1 = scmp.eq.s32.totalorder %s411_s18, 0 }
   0x9   : > { %p740_p2 = scmp.eq.s32.totalorder %s411_s18, 1  ;;  %p128_p3 = scmp.eq.s32.totalorder %s412_s19, 1 }
   0xa   : > { %s927_s20 = scalar_select %p736_p1, 1, 0 }
   0xb   : > { %s928_s21 = scalar_select %p740_p2, 1, 0 }
   0xc   : > { %p746_p4 = por %p736_p1, %p54_p0  ;;  %p413_p5 = scmp.ge.s32.totalorder %s672_s17, 1 }
   0xd   : > { %p751_p6 = por %p128_p3, %p54_p0  ;;  %p135_p7 = scmp.lt.s32.totalorder %s672_s17, 3 }
   0xe   : > { %s929_s22 = scalar_select %p746_p4, 1, 0 }
   0xf   : > { %s930_s23 = scalar_select %p751_p6, 1, 0 }
  0x10   : > { %p756_p8 = pnand %p413_p5, %p135_p7  ;;  %s674_s25 = smov [#allocation5]  }
  0x11   : > { %s147_s26 = sshll.u32 %s674_s25, 4  ;;  %s32_s28 = sadd.s32 1, %s668_s16  ;;  %s148_s26 = int_to_ptr.vmem [resolvable:$true] %s147_s26 }
  0x12   : > { %s931_s24 = scalar_select %p756_p8, 1, 0 }
  0x13   : > { %p458_p9 = pneg %p756_p8  ;;  %s528_s4 = scalar_lea.hbm %s920_s1, 512 }
  0x14   : > { %p529_p12 = scmp.ne.s32.totalorder %s920_s1, %s528_s4  ;;  %p535_p5 = scmp.lt.u32.totalorder %s528_s4, %s920_s1 }
  0x15   : > { %p765_p11 = pnand %p458_p9, %p736_p1 }
  0x17   : > { %p530_p13 = pneg %p765_p11 }
  0x19   : > { %p531_p0 = pnand %p530_p13, %p529_p12 }
  0x1b   : > { %p532_p3 = pneg %p531_p0 }
  0x1d   : > { %p537_p7 = pnand %p535_p5, %p532_p3 }
  0x1f   : > { %540 = shalt.err (!%p537_p7)
}
  0x20   : > { %s541_s9 = scalar_lea.vmem %s148_s26, 512  ;;  %p549_p1 = scmp.lt.s32.totalorder %s148_s26, %s148_s26 }
  0x21   : > { %p542_p9 = scmp.ne.s32.totalorder %s148_s26, %s541_s9  ;;  %p550_p4 = scmp.lt.s32.totalorder %s541_s9, %s541_s9 }
  0x23   : > { %p544_p10 = pnand %p542_p9, %p530_p13  ;;  %p551_p8 = por %p550_p4, %p549_p1 }
  0x25   : > { %p545_p6 = pneg %p544_p10 }
  0x27   : > { %p552_p2 = pnand %p551_p8, %p545_p6 }
  0x29   : > { %555 = shalt.err (!%p552_p2)
}
  0x2a   : > { %s675_s10 = smov 128   ;;  %s676_s11 = smov 8  }
  0x2b   : > { %461 = dma.hbm_to_vmem [thread:$0]  (!%p765_p11), %s920_s1, 512, %s148_s26, [#allocation6], %s675_s10, %s675_s10, %s676_s11  }
  0x2c   : > { %p34_p1 = scmp.ge.s32.totalorder %s32_s28, 2  ;;  %s41_s25 = sadd.s32 1, %s660_s14 }
  0x2d   : > { %p48_p2 = scmp.ne.s32.totalorder %s660_s14, %s656_s13  ;;  %p49_p4 = scmp.eq.s32.totalorder %s672_s17, 0 }
  0x2e   : > { %s948_s28 = smov (%p34_p1, %s32_s28), 0  ;;  %p934_p8 = scmp.ne.s32.totalorder %s928_s21, 0 }
  0x2f   : > { %p792_p6 = por %p49_p4, %p48_p2  ;;  %s36_s27 = ssub.s32 %s668_s16, %s948_s28 }
  0x30   : > { %p798_p10 = por %p934_p8, %p48_p2  ;;  %p471_p12 = scmp.lt.s32.totalorder %s672_s17, 2 }
  0x31   : > { %p39_p11 = scmp.eq.s32.totalorder %s36_s27, 0  ;;  %s164_s26 = sand.u32 1, %s660_s14  }
  0x32   : > { %s416_s4 = sshll.u32 %s164_s26, 3  ;;  %s417_s6 = sshll.u32 %s668_s16, 7 }
  0x33   : > { %s807_s5 = scalar_select %p39_p11, %s660_s14, %s41_s25  }
  0x34   : > { %s813_s9 = scalar_lea.hbm %s919_s0, %s417_s6  ;;  %s168_s21 = scalar_lea.vmem [#allocation2], %s416_s4 }
  0x35   : > { %s176_s10 = sshll.u32 %s168_s21, 4  ;;  %p819_p13 = pnand %p471_p12, %p792_p6  ;;  %s815_s10 = int_to_ptr.vmem [resolvable:$true] %s176_s10 }
  0x36   : > { %s165_s18 = scalar_lea.sflag [#allocation3], %s164_s26  ;;  %s556_s19 = scalar_lea.hbm %s813_s9, 128 }
  0x37   : > { %p557_p0 = scmp.ne.s32.totalorder %s813_s9, %s556_s19  ;;  %p558_p3 = pneg %p819_p13 }
  0x38   : > { %s561_s4 = scalar_lea.hbm %s919_s0, 256  ;;  %p562_p9 = scmp.lt.u32.totalorder %s813_s9, %s919_s0 }
  0x39   : > { %p559_p5 = pnand %p558_p3, %p557_p0  ;;  %p563_p1 = scmp.lt.u32.totalorder %s561_s4, %s556_s19 }
  0x3a   : > { %p565_p4 = scmp.lt.u32.totalorder %s556_s19, %s813_s9 }
  0x3b   : > { %p560_p7 = pneg %p559_p5  ;;  %p564_p2 = por %p563_p1, %p562_p9 }
  0x3d   : > { %p566_p6 = por %p565_p4, %p564_p2 }
  0x3f   : > { %p567_p8 = pnand %p566_p6, %p560_p7 }
  0x41   : > { %570 = shalt.err (!%p567_p8)
}
  0x42   : > { %s571_s26 = scalar_lea.vmem %s815_s10, 128  ;;  %s677_s7 = smov [#allocation2]  }
  0x43   : > { %p572_p12 = scmp.ne.s32.totalorder %s815_s10, %s571_s26  ;;  %s576_s8 = sshll.u32 %s677_s7, 4  ;;  %s577_s8 = int_to_ptr.vmem [resolvable:$false] %s576_s8 }
  0x44   : > { %s578_s21 = scalar_lea.vmem %s577_s8, 256  ;;  %p579_p5 = scmp.lt.s32.totalorder %s815_s10, %s577_s8 }
  0x45   : > { %p574_p11 = pnand %p572_p12, %p558_p3  ;;  %p580_p9 = scmp.lt.s32.totalorder %s578_s21, %s571_s26 }
  0x47   : > { %p575_p0 = pneg %p574_p11  ;;  %p581_p1 = por %p580_p9, %p579_p5 }
  0x49   : > { %p582_p2 = pnand %p581_p1, %p575_p0 }
  0x4b   : > { %585 = shalt.err (!%p582_p2)
}
  0x4c   : > { %465 = dma.hbm_to_vmem [thread:$0]  (!%p819_p13), %s813_s9, 128, %s815_s10, %s165_s18  }
  0x4d   : > { %p937_p7 = scmp.ne.s32.totalorder %s931_s24, 0 }
  0x4e   : > { %s851_s19 = sand.u32 (!%p937_p7), 1, %s656_s13   ;;  %p938_p3 = scmp.ne.s32.totalorder (!%p937_p7), %s929_s22, 0 }
  0x4f   : > { %185 = sbr.rel (%p937_p7) target bundleno = 329 (0x149), region = 32  ;;  %s419_s25 = sshll.u32 (!%p937_p7), %s851_s19, 3 }
  0x50   : > { %s188_s27 = scalar_lea.sflag (!%p937_p7), [#allocation3], %s851_s19  ;;  %s191_s4 = scalar_lea.vmem (!%p937_p7), [#allocation2], %s419_s25 }
  0x56   : > { %639 = dma.done.wait (%p938_p3), %s188_s27, 128  }
  0x57   : > { %641 = vsyncadd (%p938_p3), %s188_s27, 4294967168  ;;  %p939_p4 = scmp.ne.s32.totalorder %s927_s20, 0 }
  0x59   : > { %643 = dma.done.wait (%p939_p4), [#allocation6], 512  }
  0x5a   : > { %645 = vsyncadd (%p939_p4), [#allocation6], 4294966784  ;;  %v678_v0 = vmov 0.0|0.0   ;;  %vm679_vm0 = vmmov 0   ;;  %v680_v1 = vmov 0.0   ;;  %v219_v2 = vld [vmem:[#allocation5] sm:$0xff] }
  0x5b   : > { %444 = vmatprep.subr.bf16.mxu0 %v678_v0  ;;  %441 = vmatprep.mubr.msk.f32.mxu0 %vm679_vm0, %v680_v1  ;;  %v220_v3 = vld [vmem:[#allocation5 + $0x8] sm:$0xff]  ;;  %v221_v4 = vld [vmem:[#allocation5 + $0x10] sm:$0xff]  ;;  %v222_v6 = vld [vmem:[#allocation5 + $0x18] sm:$0xff]  ;;  %vm230_vm1 = vcmask 261120   ;;  %s425_s24 = sshll.u32 %s664_s15, 7  ;;  %s217_s9 = scalar_lea.vmem [#allocation7], %s419_s25 }
  0x5c   : > { %v445_v5 = vpack.c.bf16 %v220_v3, %v219_v2  ;;  %v448_v7 = vpack.c.bf16 %v222_v6, %v221_v4  ;;  %v218_v8 = vld [vmem:[%s191_s4] sm:$0xff]  ;;  %s321_s10 = sshll.u32 %s217_s9, 4  ;;  %vm304_vm2 = vcmask 785408   ;;  %s870_s29 = scalar_lea.hbm %s922_s3, %s425_s24  ;;  %s872_s10 = int_to_ptr.vmem [resolvable:$true] %s321_s10 }
  0x5d   : > { %v422_v9 = vld [vmem:[%s921_s2] ss:$0 sm:$0xff]  ;;  %s307_s6 = scalar_lea.sflag [#allocation4], %s851_s19  ;;  %s586_s26 = scalar_lea.vmem %s872_s10, 128 }
  0x5e   : > { %446 = vmatpush3.bf16.msra.mxu0 %v445_v5  ;;  %p587_p13 = scmp.ne.s32.totalorder %s872_s10, %s586_s26  ;;  %s681_s15 = smov [#allocation7]  }
  0x5f   : > { %447 = vmatprep.subr.bf16.mxu0 %v678_v0  ;;  %s590_s7 = sshll.u32 %s681_s15, 4  ;;  %s591_s7 = int_to_ptr.vmem [resolvable:$false] %s590_s7 }
  0x60   : > { %p588_p6 = pnand %p587_p13, %p798_p10  ;;  %s592_s8 = scalar_lea.vmem %s591_s7, 256 }
  0x61   : > { %p593_p12 = scmp.lt.s32.totalorder %s872_s10, %s591_s7  ;;  %p594_p11 = scmp.lt.s32.totalorder %s592_s8, %s586_s26 }
  0x62   : > { %449 = vmatpush3.bf16.msra.mxu0 %v448_v7  ;;  %p589_p8 = pneg %p588_p6 }
  0x63   : > { %p595_p0 = por %p594_p11, %p593_p12 }
  0x65   : > { %442 = vmatmul.mubr.msk.f32.vlgmr.msra.gmra.mrb[0].mxu0 %vm230_vm1, %v218_v8  ;;  %p596_p5 = pnand %p595_p0, %p589_p8 }
 0x138   : > { %v300_v10 = vpop.f32.mrb[0].mxu0 }
 0x139   : > { %v301_v11 = vadd.f32 %v422_v9, %v300_v10  ;;  %v443_v12 = vpop.f32.mrb[1].mxu0 }
 0x13b   : > { %305 = vst.msk [vmem:[%s217_s9] sm:$0xff] %vm304_vm2, %v301_v11 }
 0x13c   : > { %599 = shalt.err (!%p596_p5)
}
 0x13d   : > { %s600_s21 = scalar_lea.hbm %s870_s29, 128  ;;  %s604_s27 = scalar_lea.hbm %s922_s3, 256 }
 0x13e   : > { %p601_p9 = scmp.ne.s32.totalorder %s870_s29, %s600_s21  ;;  %p605_p7 = scmp.lt.u32.totalorder %s870_s29, %s922_s3 }
 0x13f   : > { %p606_p3 = scmp.lt.u32.totalorder %s604_s27, %s600_s21  ;;  %p608_p13 = scmp.lt.u32.totalorder %s600_s21, %s870_s29 }
 0x140   : > { %p602_p1 = pnand %p601_p9, %p798_p10 }
 0x141   : > { %p607_p4 = por %p606_p3, %p605_p7 }
 0x142   : > { %p603_p2 = pneg %p602_p1 }
 0x143   : > { %p609_p6 = por %p608_p13, %p607_p4 }
 0x145   : > { %p610_p8 = pnand %p609_p6, %p603_p2 }
 0x147   : > { %613 = shalt.err (!%p610_p8)
}
 0x148   : > { %456 = dma.vmem_to_hbm [thread:$0]  (%p798_p10), %s872_s10, 128, %s870_s29, %s307_s6  }
 0x149 PF: > { %s333_s22 = sand.u32 1, %s652_s12   ;;  %p940_p12 = scmp.ne.s32.totalorder %s930_s23, 0 }
 0x14a   : > { %p941_p11 = scmp.ge.s32.totalorder %s672_s17, 2  ;;  %s334_s24 = scalar_lea.sflag [#allocation4], %s333_s22 }
 0x14c   : > { %p467_p0 = pnand %p941_p11, %p940_p12 }
 0x14e   : > { %647 = dma.done.wait (!%p467_p0), %s334_s24, 128  }
 0x14f   : > { %649 = vsyncadd (!%p467_p0), %s334_s24, 4294967168  ;;  %s20_s17 = sadd.s32 1, %s672_s17   ;;  %s942_s12 = smov %s656_s13 }
 0x150   : > { %p17_p5 = scmp.ge.s32.totalorder %s20_s17, 4   ;;  %s943_s13 = smov %s660_s14 }
 0x151   : > { %s944_s14 = smov %s807_s5  ;;  %s945_s15 = smov %s668_s16 }
 0x152   : > { %s946_s16 = smov %s948_s28  ;;  %19 = sbr.rel (!%p17_p5) target bundleno = 7 (0x7), region = 81 }
 0x159   :  { %339 = vsyncpa [#allocation3], 1 }
 0x15a   :  { %341 = vsyncpa [#allocation3 + $0x1], 1 }
 0x15b   :  { %342 = vsyncpa [#allocation6], 1 }
 0x15c   :  { %343 = vsyncpa [#allocation4], 1 }
 0x15d   :  { %345 = vsyncpa [#allocation4 + $0x1], 1 }

</bundles_post_ra>
